<compile_context>
chip_gen: v5e
topology: v5e:2x2
jax: 0.10.0
libtpu: 0.0.40
codegen_flags: <defaults>
</compile_context>

<pallas_src>
import functools

import jax
import jax.numpy as jnp
from jax.experimental import pallas as pl
from jax.experimental.pallas import tpu as pltpu

_LANE = 128
_MiB = 1024 * 1024


# --------------------------------------------------------------------------- #
# Tiling helpers
# --------------------------------------------------------------------------- #

def _vmem_capacity_bytes():
    """Generation-aware VMEM size (v5e/v6e: 128 MiB; v7x: 64 MiB per TC)."""
    try:
        return int(pltpu.get_tpu_info().vmem_capacity_bytes)
    except Exception:
        return 64 * _MiB  # conservative fallback (v7x per-TensorCore VMEM)


def _choose_tiles(batch, length, n_agents, itemsize, budget_bytes):
    """Pick (tb, ta) block sizes for the [B, L, A] inputs.

    * ta (lane / agent tile): full extent whenever one batch row of one input
      fits the per-buffer budget, else the largest multiple of 128 that does.
      No wrapper-side padding — pl.cdiv edge blocks handle the remainder.
    * tb packs as many batch rows as fit in the per-buffer budget.
    * Keeps >= 2 grid steps whenever batch >= 2 (v7x has 2 TensorCores).
    """
    col_bytes = length * itemsize
    if n_agents <= _LANE or n_agents * col_bytes <= budget_bytes:
        ta = n_agents
    else:
        ta = max(_LANE, (budget_bytes // col_bytes) // _LANE * _LANE)
    tb = max(1, min(batch, budget_bytes // max(1, length * ta * itemsize)))
    if batch >= 2 and pl.cdiv(batch, tb) * pl.cdiv(n_agents, ta) < 2:
        tb = pl.cdiv(batch, 2)
    return tb, ta


# --------------------------------------------------------------------------- #
# Fused kernel: AlignDifferential -> Length('xy') -> MaxPoolTrinary -> SoftLarge
# --------------------------------------------------------------------------- #

def _moving_trinary_kernel(sx_ref, sy_ref, alpha_ref, scale_ref, o_ref, *,
                           side, length):
    L = length
    x = sx_ref[...]                                   # (TB, L, TA)
    y = sy_ref[...]

    # AlignDifferential, expressed directly as squared xy-speed per time step.
    #   t = 0      : d = s[1] - s[0]
    #   0 < t < L-1: d = (s[t+1] - s[t-1]) / 2
    #   t = L-1    : d = s[L-1] - s[L-2]
    dxm = (x[:, 2:, :] - x[:, :L - 2, :]) * 0.5       # t = 1 .. L-2
    dym = (y[:, 2:, :] - y[:, :L - 2, :]) * 0.5
    sq_mid = dxm * dxm + dym * dym                    # (TB, L-2, TA)

    dx0 = x[:, 1:2, :] - x[:, 0:1, :]                 # t = 0
    dy0 = y[:, 1:2, :] - y[:, 0:1, :]
    sq_first = dx0 * dx0 + dy0 * dy0                  # (TB, 1, TA)

    dxl = x[:, L - 1:L, :] - x[:, L - 2:L - 1, :]     # t = L-1
    dyl = y[:, L - 1:L, :] - y[:, L - 2:L - 1, :]
    sq_last = dxl * dxl + dyl * dyl                   # (TB, 1, TA)

    # MaxPoolTrinary on the squared speed (sqrt is monotonic, so it commutes
    # with max); segments over t: [0, side), [side, L-side), [L-side, L).
    m0 = sq_first
    m2 = sq_last
    if side > 1:  # static Python branch; side == 1 only for L in {3, 4}
        m0 = jnp.maximum(
            m0, jnp.max(sq_mid[:, :side - 1, :], axis=1, keepdims=True))
        m2 = jnp.maximum(
            m2, jnp.max(sq_mid[:, L - side - 1:, :], axis=1, keepdims=True))
    m1 = jnp.max(sq_mid[:, side - 1:L - side - 1, :], axis=1, keepdims=True)

    # Length('xy') + SoftLarge heads (per-agent alpha / 1/exp(beta) vectors).
    alpha = alpha_ref[...]                            # (1, 1, TA)
    scale = scale_ref[...]

    def head(m_sq):
        return jax.nn.sigmoid((jnp.sqrt(m_sq) - alpha) * scale)

    o_ref[:, 0:1, :] = head(m0).astype(o_ref.dtype)
    o_ref[:, 1:2, :] = head(m1).astype(o_ref.dtype)
    o_ref[:, 2:3, :] = head(m2).astype(o_ref.dtype)


def moving_forward_trinary(states, alpha_ball, beta_ball, alpha_player,
                           beta_player, *, block_budget_bytes=None,
                           min_pallas_elements=0):
    """Moving(trinary=True).forward: states [B, L, A, D] -> [B, 3, A, 1]."""
    assert states.ndim == 4
    B, L, A, D = states.shape
    assert L >= 3 and D >= 2

    # Size guard (review item): tiny inputs are launch-overhead dominated —
    # let XLA fuse the whole thing instead of paying a pallas_call dispatch.
    if B * L * A * D < min_pallas_elements:
        return _moving_ref(states, alpha_ball, beta_ball, alpha_player,
                           beta_player)

    dtype = states.dtype
    itemsize = jnp.dtype(dtype).itemsize

    # x/y position channels with agents on the lane axis (layout plumbing only;
    # the heavy [B, L, A] arrays are then read exactly once by the kernel).
    sx = states[..., 0]                               # [B, L, A]
    sy = states[..., 1]

    # Per-agent SoftLarge parameters (agent 0 = ball, agents 1: = players).
    agent_is_ball = jnp.arange(A) == 0
    alpha_vec = jnp.where(agent_is_ball, alpha_ball,
                          alpha_player).astype(dtype).reshape(1, 1, A)
    scale_vec = jnp.where(agent_is_ball, jnp.exp(-beta_ball),
                          jnp.exp(-beta_player)).astype(dtype).reshape(1, 1, A)

    vmem_cap = _vmem_capacity_bytes()
    if block_budget_bytes is None:
        # Per-input-buffer budget, pre multi-buffering: ~8 MiB on 128 MiB VMEM
        # parts (v5e/v6e), ~4 MiB on 64 MiB parts (v7x) — leaves headroom for
        # 2 inputs x up-to-3 pipeline buffers under vmem_limit_bytes.
        block_budget_bytes = max(2 * _MiB, vmem_cap // 16)
    vmem_limit = int(min(64 * _MiB, max(32 * _MiB, vmem_cap // 2)))

    side = (L + 1) // 3
    tb, ta = _choose_tiles(B, L, A, itemsize, block_budget_bytes)
    grid = (pl.cdiv(B, tb), pl.cdiv(A, ta))
    n_steps = grid[0] * grid[1]

    def _input_spec():
        idx = lambda b, a: (b, 0, a)
        if n_steps >= 4:
            try:  # deeper input pipelining keeps DMAs back-to-back (v7x)
                return pl.BlockSpec((tb, L, ta), idx,
                                    pipeline_mode=pl.Buffered(3))
            except TypeError:
                pass
        return pl.BlockSpec((tb, L, ta), idx)

    kernel = functools.partial(_moving_trinary_kernel, side=side, length=L)
    cost = pl.CostEstimate(
        flops=10 * B * L * A + 8 * B * 3 * A,
        transcendentals=B * 3 * A * 2,
        bytes_accessed=(2 * B * L * A + B * 3 * A + 2 * A) * itemsize,
    )

    out = pl.pallas_call(
        kernel,
        out_shape=jax.ShapeDtypeStruct((B, 3, A), dtype),
        grid_spec=pltpu.PrefetchScalarGridSpec(
            num_scalar_prefetch=0,
            grid=grid,
            in_specs=[
                _input_spec(),
                _input_spec(),
                pl.BlockSpec((1, 1, ta), lambda b, a: (0, 0, a)),
                pl.BlockSpec((1, 1, ta), lambda b, a: (0, 0, a)),
            ],
            out_specs=pl.BlockSpec((tb, 3, ta), lambda b, a: (b, 0, a)),
        ),
        compiler_params=pltpu.CompilerParams(
            dimension_semantics=("parallel", "parallel"),
            vmem_limit_bytes=vmem_limit,
        ),
        cost_estimate=cost,
    )(sx, sy, alpha_vec, scale_vec)

    return out[..., None]                             # [B, 3, A, 1]


# --------------------------------------------------------------------------- #
# Pure-JAX reference (mirrors the PyTorch module)
# --------------------------------------------------------------------------- #

def _align_differential_ref(states):
    first = states[:, 0:1] * 2 - states[:, 1:2]
    last = states[:, -1:] * 2 - states[:, -2:-1]
    padded = jnp.concatenate([first, states, last], axis=1)
    return (padded[:, 2:] - padded[:, :-2]) / 2


def _maxpool_trinary_ref(states):
    L = states.shape[1]
    side = (L + 1) // 3
    return jnp.concatenate(
        [jnp.max(states[:, :side], axis=1, keepdims=True),
         jnp.max(states[:, side:L - side], axis=1, keepdims=True),
         jnp.max(states[:, L - side:], axis=1, keepdims=True)], axis=1)


def _moving_ref(states, alpha_ball, beta_ball, alpha_player, beta_player):
    def speed_branch(pos):                            # [B, L, a, D]
        diff = _align_differential_ref(pos)
        length = jnp.sqrt(jnp.sum(diff[..., 0:2] ** 2, axis=-1, keepdims=True))
        return _maxpool_trinary_ref(length)           # [B, 3, a, 1]

    ball = jax.nn.sigmoid(
        (speed_branch(states[:, :, :1]) - alpha_ball) / jnp.exp(beta_ball))
    player = jax.nn.sigmoid(
        (speed_branch(states[:, :, 1:]) - alpha_player) / jnp.exp(beta_player))
    return jnp.concatenate([ball, player], axis=2)    # [B, 3, A, 1]


# --------------------------------------------------------------------------- #
# Tests
# --------------------------------------------------------------------------- #

if __name__ == "__main__":
    key = jax.random.PRNGKey(0)
    k1, k2, k3 = jax.random.split(key, 3)

    alpha_ball, beta_ball = jnp.float32(0.3), jnp.float32(-0.2)
    alpha_player, beta_player = jnp.float32(0.1), jnp.float32(0.4)
    params = (alpha_ball, beta_ball, alpha_player, beta_player)

    # 1) Production-like shape: [batch=2, length=12, n_agents=6, state_dim=4].
    s1 = jax.random.normal(k1, (2, 12, 6, 4), dtype=jnp.float32)
    o1 = jax.block_until_ready(moving_forward_trinary(s1, *params))
    r1 = _moving_ref(s1, *params)
    assert o1.shape == (2, 3, 6, 1), o1.shape
    assert jnp.allclose(o1, r1, atol=1e-5, rtol=1e-5), "mismatch (shape 1)"

    # 2) Minimum trinary length (L=3) and a batch edge block (B=3, tb=2).
    s2 = jax.random.normal(k2, (3, 3, 6, 4), dtype=jnp.float32)
    o2 = jax.block_until_ready(moving_forward_trinary(s2, *params))
    r2 = _moving_ref(s2, *params)
    assert o2.shape == (3, 3, 6, 1), o2.shape
    assert jnp.allclose(o2, r2, atol=1e-5, rtol=1e-5), "mismatch (shape 2)"

    # 3) Larger agent count with a tiny forced budget: exercises agent-axis
    #    tiling (ta=128 with an OOB lane-edge block), a multi-step grid and the
    #    deeper input pipelining path.
    s3 = jax.random.normal(k3, (4, 10, 200, 5), dtype=jnp.float32)
    o3 = jax.block_until_ready(
        moving_forward_trinary(s3, *params, block_budget_bytes=4096))
    r3 = _moving_ref(s3, *params)
    assert o3.shape == (4, 3, 200, 1), o3.shape
    assert jnp.allclose(o3, r3, atol=1e-5, rtol=1e-5), "mismatch (shape 3)"

    # 4) Tiny-input guard: falls back to the fully-fused XLA path.
    o4 = jax.block_until_ready(
        moving_forward_trinary(s1, *params, min_pallas_elements=10_000))
    assert jnp.allclose(o4, r1, atol=1e-6, rtol=1e-6), "mismatch (fallback)"

    print("KERNEL_OK")
</pallas_src>

<mosaic_0001>
module attributes {stable_mosaic.version = 11 : i64} {
  func.func @_moving_trinary_kernel(%arg0: i32, %arg1: i32, %arg2: memref<1x12x6xf32, #tpu.memory_space<vmem>>, %arg3: memref<1x12x6xf32, #tpu.memory_space<vmem>>, %arg4: memref<1x1x6xf32, #tpu.memory_space<vmem>>, %arg5: memref<1x1x6xf32, #tpu.memory_space<vmem>>, %arg6: memref<1x3x6xf32, #tpu.memory_space<vmem>>) attributes {dimension_semantics = [#tpu.dimension_semantics<parallel>, #tpu.dimension_semantics<parallel>], iteration_bounds = array<i64: 2, 1>, scalar_prefetch = 0 : i64, scratch_operands = 0 : i64, tpu.core_type = #tpu.core_type<tc>, window_params = [{transform_indices = @transform_0, window_bounds = array<i64: 1, 12, 6>}, {transform_indices = @transform_1, window_bounds = array<i64: 1, 12, 6>}, {transform_indices = @transform_2, window_bounds = array<i64: 1, 1, 6>}, {transform_indices = @transform_3, window_bounds = array<i64: 1, 1, 6>}, {transform_indices = @transform_4, window_bounds = array<i64: 1, 3, 6>}]} {
    %c0 = arith.constant 0 : index
    %c0_0 = arith.constant 0 : index
    %c0_1 = arith.constant 0 : index
    %0 = vector.load %arg2[%c0, %c0_0, %c0_1] : memref<1x12x6xf32, #tpu.memory_space<vmem>>, vector<1x12x6xf32>
    %c0_2 = arith.constant 0 : index
    %c0_3 = arith.constant 0 : index
    %c0_4 = arith.constant 0 : index
    %1 = vector.load %arg3[%c0_2, %c0_3, %c0_4] : memref<1x12x6xf32, #tpu.memory_space<vmem>>, vector<1x12x6xf32>
    %2 = vector.extract_strided_slice %0 {offsets = [0, 2, 0], sizes = [1, 10, 6], strides = [1, 1, 1]} : vector<1x12x6xf32> to vector<1x10x6xf32>
    %3 = vector.extract_strided_slice %0 {offsets = [0, 0, 0], sizes = [1, 10, 6], strides = [1, 1, 1]} : vector<1x12x6xf32> to vector<1x10x6xf32>
    %4 = arith.subf %2, %3 : vector<1x10x6xf32>
    %cst = arith.constant 5.000000e-01 : f32
    %5 = vector.broadcast %cst : f32 to vector<1x10x6xf32>
    %6 = arith.mulf %4, %5 : vector<1x10x6xf32>
    %7 = vector.extract_strided_slice %1 {offsets = [0, 2, 0], sizes = [1, 10, 6], strides = [1, 1, 1]} : vector<1x12x6xf32> to vector<1x10x6xf32>
    %8 = vector.extract_strided_slice %1 {offsets = [0, 0, 0], sizes = [1, 10, 6], strides = [1, 1, 1]} : vector<1x12x6xf32> to vector<1x10x6xf32>
    %9 = arith.subf %7, %8 : vector<1x10x6xf32>
    %cst_5 = arith.constant 5.000000e-01 : f32
    %10 = vector.broadcast %cst_5 : f32 to vector<1x10x6xf32>
    %11 = arith.mulf %9, %10 : vector<1x10x6xf32>
    %12 = arith.mulf %6, %6 : vector<1x10x6xf32>
    %13 = arith.mulf %11, %11 : vector<1x10x6xf32>
    %14 = arith.addf %12, %13 : vector<1x10x6xf32>
    %15 = vector.extract_strided_slice %0 {offsets = [0, 1, 0], sizes = [1, 1, 6], strides = [1, 1, 1]} : vector<1x12x6xf32> to vector<1x1x6xf32>
    %16 = vector.extract_strided_slice %0 {offsets = [0, 0, 0], sizes = [1, 1, 6], strides = [1, 1, 1]} : vector<1x12x6xf32> to vector<1x1x6xf32>
    %17 = arith.subf %15, %16 : vector<1x1x6xf32>
    %18 = vector.extract_strided_slice %1 {offsets = [0, 1, 0], sizes = [1, 1, 6], strides = [1, 1, 1]} : vector<1x12x6xf32> to vector<1x1x6xf32>
    %19 = vector.extract_strided_slice %1 {offsets = [0, 0, 0], sizes = [1, 1, 6], strides = [1, 1, 1]} : vector<1x12x6xf32> to vector<1x1x6xf32>
    %20 = arith.subf %18, %19 : vector<1x1x6xf32>
    %21 = arith.mulf %17, %17 : vector<1x1x6xf32>
    %22 = arith.mulf %20, %20 : vector<1x1x6xf32>
    %23 = arith.addf %21, %22 : vector<1x1x6xf32>
    %24 = vector.extract_strided_slice %0 {offsets = [0, 11, 0], sizes = [1, 1, 6], strides = [1, 1, 1]} : vector<1x12x6xf32> to vector<1x1x6xf32>
    %25 = vector.extract_strided_slice %0 {offsets = [0, 10, 0], sizes = [1, 1, 6], strides = [1, 1, 1]} : vector<1x12x6xf32> to vector<1x1x6xf32>
    %26 = arith.subf %24, %25 : vector<1x1x6xf32>
    %27 = vector.extract_strided_slice %1 {offsets = [0, 11, 0], sizes = [1, 1, 6], strides = [1, 1, 1]} : vector<1x12x6xf32> to vector<1x1x6xf32>
    %28 = vector.extract_strided_slice %1 {offsets = [0, 10, 0], sizes = [1, 1, 6], strides = [1, 1, 1]} : vector<1x12x6xf32> to vector<1x1x6xf32>
    %29 = arith.subf %27, %28 : vector<1x1x6xf32>
    %30 = arith.mulf %26, %26 : vector<1x1x6xf32>
    %31 = arith.mulf %29, %29 : vector<1x1x6xf32>
    %32 = arith.addf %30, %31 : vector<1x1x6xf32>
    %33 = vector.extract_strided_slice %14 {offsets = [0, 0, 0], sizes = [1, 3, 6], strides = [1, 1, 1]} : vector<1x10x6xf32> to vector<1x3x6xf32>
    %cst_6 = arith.constant dense<0xFF800000> : vector<1x6xf32>
    %34 = vector.multi_reduction <maximumf>, %33, %cst_6 [1] : vector<1x3x6xf32> to vector<1x6xf32>
    %35 = vector.shape_cast %34 : vector<1x6xf32> to vector<1x1x6xf32>
    %36 = arith.maximumf %23, %35 : vector<1x1x6xf32>
    %37 = vector.extract_strided_slice %14 {offsets = [0, 7, 0], sizes = [1, 3, 6], strides = [1, 1, 1]} : vector<1x10x6xf32> to vector<1x3x6xf32>
    %cst_7 = arith.constant dense<0xFF800000> : vector<1x6xf32>
    %38 = vector.multi_reduction <maximumf>, %37, %cst_7 [1] : vector<1x3x6xf32> to vector<1x6xf32>
    %39 = vector.shape_cast %38 : vector<1x6xf32> to vector<1x1x6xf32>
    %40 = arith.maximumf %32, %39 : vector<1x1x6xf32>
    %41 = vector.extract_strided_slice %14 {offsets = [0, 3, 0], sizes = [1, 4, 6], strides = [1, 1, 1]} : vector<1x10x6xf32> to vector<1x4x6xf32>
    %cst_8 = arith.constant dense<0xFF800000> : vector<1x6xf32>
    %42 = vector.multi_reduction <maximumf>, %41, %cst_8 [1] : vector<1x4x6xf32> to vector<1x6xf32>
    %43 = vector.shape_cast %42 : vector<1x6xf32> to vector<1x1x6xf32>
    %c0_9 = arith.constant 0 : index
    %c0_10 = arith.constant 0 : index
    %c0_11 = arith.constant 0 : index
    %44 = vector.load %arg4[%c0_9, %c0_10, %c0_11] : memref<1x1x6xf32, #tpu.memory_space<vmem>>, vector<1x1x6xf32>
    %c0_12 = arith.constant 0 : index
    %c0_13 = arith.constant 0 : index
    %c0_14 = arith.constant 0 : index
    %45 = vector.load %arg5[%c0_12, %c0_13, %c0_14] : memref<1x1x6xf32, #tpu.memory_space<vmem>>, vector<1x1x6xf32>
    %46 = math.sqrt %36 : vector<1x1x6xf32>
    %47 = arith.subf %46, %44 : vector<1x1x6xf32>
    %48 = arith.mulf %47, %45 : vector<1x1x6xf32>
    %49 = arith.negf %48 : vector<1x1x6xf32>
    %50 = math.exp %49 : vector<1x1x6xf32>
    %cst_15 = arith.constant 1.000000e+00 : f32
    %51 = vector.broadcast %cst_15 : f32 to vector<1x1x6xf32>
    %52 = arith.addf %51, %50 : vector<1x1x6xf32>
    %53 = arith.divf %51, %52 : vector<1x1x6xf32>
    %c0_16 = arith.constant 0 : index
    %c0_17 = arith.constant 0 : index
    %c0_18 = arith.constant 0 : index
    %54 = vector.load %arg6[%c0_16, %c0_17, %c0_18] : memref<1x3x6xf32, #tpu.memory_space<vmem>>, vector<1x1x6xf32>
    tpu.vector_store %arg6[%c0_16, %c0_17, %c0_18], %53 {strides = array<i32>} : memref<1x3x6xf32, #tpu.memory_space<vmem>>, vector<1x1x6xf32>,
    %55 = math.sqrt %43 : vector<1x1x6xf32>
    %56 = arith.subf %55, %44 : vector<1x1x6xf32>
    %57 = arith.mulf %56, %45 : vector<1x1x6xf32>
    %58 = arith.negf %57 : vector<1x1x6xf32>
    %59 = math.exp %58 : vector<1x1x6xf32>
    %cst_19 = arith.constant 1.000000e+00 : f32
    %60 = vector.broadcast %cst_19 : f32 to vector<1x1x6xf32>
    %61 = arith.addf %60, %59 : vector<1x1x6xf32>
    %62 = arith.divf %60, %61 : vector<1x1x6xf32>
    %c0_20 = arith.constant 0 : index
    %c1 = arith.constant 1 : index
    %c0_21 = arith.constant 0 : index
    %63 = vector.load %arg6[%c0_20, %c1, %c0_21] : memref<1x3x6xf32, #tpu.memory_space<vmem>>, vector<1x1x6xf32>
    tpu.vector_store %arg6[%c0_20, %c1, %c0_21], %62 {strides = array<i32>} : memref<1x3x6xf32, #tpu.memory_space<vmem>>, vector<1x1x6xf32>,
    %64 = math.sqrt %40 : vector<1x1x6xf32>
    %65 = arith.subf %64, %44 : vector<1x1x6xf32>
    %66 = arith.mulf %65, %45 : vector<1x1x6xf32>
    %67 = arith.negf %66 : vector<1x1x6xf32>
    %68 = math.exp %67 : vector<1x1x6xf32>
    %cst_22 = arith.constant 1.000000e+00 : f32
    %69 = vector.broadcast %cst_22 : f32 to vector<1x1x6xf32>
    %70 = arith.addf %69, %68 : vector<1x1x6xf32>
    %71 = arith.divf %69, %70 : vector<1x1x6xf32>
    %c0_23 = arith.constant 0 : index
    %c2 = arith.constant 2 : index
    %c0_24 = arith.constant 0 : index
    %72 = vector.load %arg6[%c0_23, %c2, %c0_24] : memref<1x3x6xf32, #tpu.memory_space<vmem>>, vector<1x1x6xf32>
    tpu.vector_store %arg6[%c0_23, %c2, %c0_24], %71 {strides = array<i32>} : memref<1x3x6xf32, #tpu.memory_space<vmem>>, vector<1x1x6xf32>,
    return
  }
  func.func @transform_0(%arg0: i32, %arg1: i32) -> (i32, i32, i32) {
    %c0_i32 = arith.constant 0 : i32
    %c0_i32_0 = arith.constant 0 : i32
    return %arg0, %c0_i32, %arg1 : i32, i32, i32
  }
  func.func @transform_1(%arg0: i32, %arg1: i32) -> (i32, i32, i32) {
    %c0_i32 = arith.constant 0 : i32
    %c0_i32_0 = arith.constant 0 : i32
    return %arg0, %c0_i32, %arg1 : i32, i32, i32
  }
  func.func @transform_2(%arg0: i32, %arg1: i32) -> (i32, i32, i32) {
    %c0_i32 = arith.constant 0 : i32
    %c0_i32_0 = arith.constant 0 : i32
    %c0_i32_1 = arith.constant 0 : i32
    return %c0_i32, %c0_i32_0, %arg1 : i32, i32, i32
  }
  func.func @transform_3(%arg0: i32, %arg1: i32) -> (i32, i32, i32) {
    %c0_i32 = arith.constant 0 : i32
    %c0_i32_0 = arith.constant 0 : i32
    %c0_i32_1 = arith.constant 0 : i32
    return %c0_i32, %c0_i32_0, %arg1 : i32, i32, i32
  }
  func.func @transform_4(%arg0: i32, %arg1: i32) -> (i32, i32, i32) {
    %c0_i32 = arith.constant 0 : i32
    %c0_i32_0 = arith.constant 0 : i32
    return %arg0, %c0_i32, %arg1 : i32, i32, i32
  }
}

</mosaic_0001>

<bundles_post_ra>
// kernel: tpu_custom_call.1
= control target key start
LH: loop header
LB: loop body
LE: loop exit
PB: predicated region body
PF: predicated region fallthrough
CT: control target
= control target key end

     0   :  { %s710_s15 = smov 0   ;;  %s712_s16 = smov 0   ;;  %s778_s0 = inlined_call_operand.vmem [shape: f32[2,12,6], index: 0, kind: input, shape index: {}]   ;;  %s779_s1 = inlined_call_operand.vmem [shape: f32[2,12,6], index: 1, kind: input, shape index: {}]   ;;  %s780_s2 = inlined_call_operand.vmem [shape: f32[1,1,6], index: 2, kind: input, shape index: {}]   ;;  %s781_s3 = inlined_call_operand.vmem [shape: f32[1,1,6], index: 3, kind: input, shape index: {}]   ;;  %s782_s4 = inlined_call_operand.vmem [shape: f32[2,3,6], index: 4, kind: output, shape index: {}]  }
   0x1   :  { %s714_s17 = smov 0  }
   0x2 LB: > { %s26_s18 = sadd.s32 1, %s679_s16  ;;  %p604_p0 = scmp.ge.s32.totalorder %s683_s17, 1  ;;  %s683_s17 = sphi %s714_s17, %s14_s17   ;;  %s679_s16 = sphi %s712_s16, %s788_s16   ;;  %s675_s15 = sphi %s710_s15, %s787_s15  }
   0x3   : > { %p28_p1 = scmp.ge.s32.totalorder %s26_s18, 2  ;;  %p212_p2 = scmp.lt.s32.totalorder %s683_s17, 3 }
   0x5   : > { %s790_s18 = smov (%p28_p1, %s26_s18), 0  ;;  %p213_p3 = pnand %p604_p0, %p212_p2 }
   0x6   : > { %p257_p4 = scmp.lt.s32.totalorder (!%p213_p3), %s675_s15, 1 }
   0x7   : > { %216 = sbr.rel (%p213_p3) target bundleno = 98 (0x62), region = 36 }
   0xc   : > { %s792_s15 = smov (!%p257_p4, %s675_s15), 1  ;;  %vm292_vm0 = vcmask 1041408   ;;  %vm337_vm1 = vcmask 45058   ;;  %vm355_vm2 = vcmask 48133   ;;  %vm346_vm3 = vcmask 44033  }
   0xd   : > { %s615_s19 = sshll.u32 %s792_s15, 4  ;;  %vm357_vm4 = vcmask 40960   ;;  %s609_s8 = sshll.u32 %s792_s15, 2  ;;  %vm407_vm13 = vcmask 41985  }
   0xe   : > { %s264_s22 = scalar_lea.vmem %s778_s0, %s615_s19  ;;  %s272_s25 = scalar_lea.vmem %s779_s1, %s615_s19 }
   0xf   : > { %v286_v0 = vld [vmem:[%s264_s22] sm:$0xff]  ;;  %v287_v1 = vld [vmem:[%s264_s22 + $0x8] sm:$0xf]  ;;  %s285_s11 = scalar_lea.vmem %s782_s4, %s609_s8 }
  0x10   : > { %v288_v2 = vld [vmem:[%s272_s25] sm:$0xff]  ;;  %v289_v3 = vld [vmem:[%s272_s25 + $0x8] sm:$0xf]  ;;  %v293_v4 = vrot.slane %v286_v0, 6  ;;  %v294_v5 = vrot.slane %v287_v1, 6  ;;  %v319_v18 = vrot.slane %v286_v0, 7 }
  0x11   : > { %v304_v6 = vrot.slane %v288_v2, 6  ;;  %v305_v7 = vrot.slane %v289_v3, 6  ;;  %v322_v20 = vrot.slane %v288_v2, 7  ;;  %v328_v29 = vrot.slane %v287_v1, 7 }
  0x12   : > { %v298_v8 = vsub.f32 %v286_v0, %v293_v4  ;;  %v295_v10 = vsel %vm292_vm0, %v293_v4, %v294_v5  ;;  %v321_v24 = vsub.f32 %v286_v0, %v319_v18  ;;  %v331_v30 = vrot.slane %v289_v3, 7  ;;  %v642_v18 = vld [vmem:[%s781_s3] ss:$0 sm:$0xff] }
  0x13   : > { %v309_v9 = vsub.f32 %v288_v2, %v304_v6  ;;  %v299_v11 = vsub.f32 %v287_v1, %v295_v10  ;;  %v306_v14 = vsel %vm292_vm0, %v304_v6, %v305_v7  ;;  %v324_v27 = vsub.f32 %v288_v2, %v322_v20 }
  0x14   : > { %v300_v12 = vmul.f32 0.5, %v298_v8  ;;  %v310_v19 = vsub.f32 %v289_v3, %v306_v14  ;;  %v325_v34 = vmul.f32 %v321_v24, %v321_v24  ;;  %v330_v41 = vsub.f32 %v287_v1, %v328_v29  ;;  %v641_v14 = vld [vmem:[%s780_s2] ss:$0 sm:$0xff] }
  0x15   : > { %v311_v13 = vmul.f32 0.5, %v309_v9  ;;  %v301_v15 = vmul.f32 0.5, %v299_v11  ;;  %v326_v37 = vmul.f32 %v324_v27, %v324_v27  ;;  %v333_v42 = vsub.f32 %v289_v3, %v331_v30  ;;  %v366_v27 = vld [vmem:[%s780_s2] sm:$0x1] }
  0x16   : > { %v313_v16 = vmul.f32 %v300_v12, %v300_v12  ;;  %v312_v22 = vmul.f32 0.5, %v310_v19  ;;  %v334_v50 = vmul.f32 %v330_v41, %v330_v41 }
  0x17   : > { %v315_v17 = vmul.f32 %v311_v13, %v311_v13  ;;  %v314_v23 = vmul.f32 %v301_v15, %v301_v15  ;;  %v327_v46 = vadd.f32 %v326_v37, %v325_v34  ;;  %v335_v51 = vmul.f32 %v333_v42, %v333_v42 }
  0x18   : > { %v316_v26 = vmul.f32 %v312_v22, %v312_v22 }
  0x19   : > { %v317_v21 = vadd.f32 %v315_v17, %v313_v16  ;;  %v336_v58 = vadd.f32 %v335_v51, %v334_v50 }
  0x1a   : > { %v318_v31 = vadd.f32 %v316_v26, %v314_v23 }
  0x1b   : > { %v338_v25 = vsel %vm337_vm1, %v317_v21, -inf  ;;  %v356_v32 = vsel %vm355_vm2, %v317_v21, -inf }
  0x1c   : > { %v339_v28 = vrot.slane %v338_v25, 4  ;;  %v347_v35 = vsel %vm346_vm3, %v318_v31, -inf  ;;  %v358_v36 = vsel %vm357_vm4, %v318_v31, -inf  ;;  %v367_v31 = vld [vmem:[%s781_s3] sm:$0x1] }
  0x1d   : > { %v348_v39 = vrot.slane %v347_v35, 4  ;;  %v359_v40 = vmax.f32 %v356_v32, %v358_v36 }
  0x1e   : > { %v340_v33 = vmax.f32 %v338_v25, %v339_v28 }
  0x1f   : > { %v349_v44 = vmax.f32 %v347_v35, %v348_v39  ;;  %v360_v45 = vrot.slane %v359_v40, 4 }
  0x20   : > { %v341_v38 = vrot.slane %v340_v33, 2 }
  0x21   : > { %v350_v48 = vrot.slane %v349_v44, 2  ;;  %v361_v49 = vmax.f32 %v359_v40, %v360_v45 }
  0x22   : > { %v342_v43 = vmax.f32 %v340_v33, %v341_v38 }
  0x23   : > { %v351_v53 = vmax.f32 %v349_v44, %v350_v48  ;;  %v362_v54 = vrot.slane %v361_v49, 2 }
  0x24   : > { %v343_v47 = vrot.slane %v342_v43, 1 }
  0x25   : > { %v352_v56 = vrot.slane %v351_v53, 1  ;;  %v363_v57 = vmax.f32 %v361_v49, %v362_v54 }
  0x26   : > { %v344_v52 = vmax.f32 %v342_v43, %v343_v47 }
  0x27   : > { %v353_v59 = vmax.f32 %v351_v53, %v352_v56  ;;  %v364_v60 = vrot.slane %v363_v57, 1 }
  0x28   : > { %v345_v55 = vmax.f32 %v327_v46, %v344_v52 }
  0x29   : > { %v354_v61 = vmax.f32 %v336_v58, %v353_v59  ;;  %v365_v62 = vmax.f32 %v363_v57, %v364_v60 }
  0x2a   : > { %643 = vrsqrt.f32 %v345_v55  ;;  %vm375_vm5 = vcmp.eq.f32.partialorder %v345_v55, inf  ;;  %v378_v11 = vand.u32 2147483648, %v345_v55  ;;  %vm377_vm6 = vcmp.eq.f32.partialorder %v345_v55, 0.0 }
  0x2b   : > { %645 = vrsqrt.f32 %v365_v62  ;;  %vm416_vm7 = vcmp.eq.f32.partialorder %v365_v62, inf  ;;  %v419_v23 = vand.u32 2147483648, %v365_v62  ;;  %vm418_vm8 = vcmp.eq.f32.partialorder %v365_v62, 0.0 }
  0x2c   : > { %647 = vrsqrt.f32 %v354_v61  ;;  %vm450_vm9 = vcmp.eq.f32.partialorder %v354_v61, inf  ;;  %v453_v26 = vand.u32 2147483648, %v354_v61  ;;  %vm452_vm10 = vcmp.eq.f32.partialorder %v354_v61, 0.0 }
  0x30   : > { %v644_v63 = vpop.eup %643 }
  0x31   : > { %v369_v0 = vmul.f32 %v644_v63, %v345_v55  ;;  %v646_v2 = vpop.eup %645 }
  0x32   : > { %v648_v4 = vpop.eup %647  ;;  %v410_v5 = vmul.f32 %v646_v2, %v365_v62 }
  0x33   : > { %v370_v1 = vmul.f32 %v644_v63, %v369_v0  ;;  %v444_v7 = vmul.f32 %v648_v4, %v354_v61 }
  0x34   : > { %v411_v8 = vmul.f32 %v646_v2, %v410_v5 }
  0x35   : > { %v371_v3 = vmul.f32 0.5, %v370_v1  ;;  %v445_v10 = vmul.f32 %v648_v4, %v444_v7 }
  0x36   : > { %v412_v12 = vmul.f32 0.5, %v411_v8 }
  0x37   : > { %v372_v6 = vsub.f32 1.5, %v371_v3  ;;  %v446_v15 = vmul.f32 0.5, %v445_v10 }
  0x38   : > { %v413_v16 = vsub.f32 1.5, %v412_v12 }
  0x39   : > { %v373_v9 = vmul.f32 %v644_v63, %v372_v6  ;;  %v447_v19 = vsub.f32 1.5, %v446_v15 }
  0x3a   : > { %v414_v21 = vmul.f32 %v646_v2, %v413_v16 }
  0x3b   : > { %v374_v13 = vmul.f32 %v373_v9, %v345_v55  ;;  %v448_v24 = vmul.f32 %v648_v4, %v447_v19 }
  0x3c   : > { %v415_v25 = vmul.f32 %v414_v21, %v365_v62 }
  0x3d   : > { %v376_v17 = vsel %vm375_vm5, %v345_v55, %v374_v13  ;;  %v449_v29 = vmul.f32 %v448_v24, %v354_v61 }
  0x3e   : > { %v379_v20 = vsel %vm377_vm6, %v378_v11, %v376_v17  ;;  %v417_v30 = vsel %vm416_vm7, %v365_v62, %v415_v25 }
  0x3f   : > { %v383_v22 = vsub.f32 %v379_v20, %v641_v14  ;;  %v420_v33 = vsel %vm418_vm8, %v419_v23, %v417_v30  ;;  %v451_v34 = vsel %vm450_vm9, %v354_v61, %v449_v29  ;;  %vm476_vm9 = vcmask 44035  }
  0x40   : > { %v421_v35 = vsub.f32 %v420_v33, %v366_v27  ;;  %v454_v36 = vsel %vm452_vm10, %v453_v26, %v451_v34 }
  0x41   : > { %v387_v28 = vmul.f32 %v642_v18, %v383_v22  ;;  %v455_v37 = vsub.f32 %v454_v36, %v641_v14 }
  0x42   : > { %v422_v38 = vmul.f32 %v421_v35, %v367_v31 }
  0x43   : > { %v610_v32 = vmul.f32 -1.442695, %v387_v28  ;;  %v456_v39 = vmul.f32 %v642_v18, %v455_v37 }
  0x44   : > { %v611_v40 = vmul.f32 -1.442695, %v422_v38 }
  0x45   : > { %649 = vpow2.f32 %v610_v32  ;;  %v612_v41 = vmul.f32 -1.442695, %v456_v39 }
  0x46   : > { %651 = vpow2.f32 %v611_v40 }
  0x47   : > { %653 = vpow2.f32 %v612_v41 }
  0x4b   : > { %v650_v42 = vpop.eup %649 }
  0x4c   : > { %v391_v43 = vadd.f32 1.0, %v650_v42  ;;  %v652_v44 = vpop.eup %651 }
  0x4d   : > { %v654_v45 = vpop.eup %653  ;;  %v426_v46 = vadd.f32 1.0, %v652_v44 }
  0x4e   : > { %655 = vrcp.f32 %v391_v43  ;;  %v460_v47 = vadd.f32 1.0, %v654_v45  ;;  %v401_v50 = vand.u32 2147483647, %v391_v43  ;;  %v403_v51 = vand.u32 2147483648, %v391_v43 }
  0x4f   : > { %657 = vrcp.f32 %v426_v46  ;;  %vm397_vm11 = vweird.f32 %v391_v43  ;;  %vm432_vm0 = vweird.f32 %v426_v46  ;;  %v436_v61 = vand.u32 2147483647, %v426_v46 }
  0x50   : > { %659 = vrcp.f32 %v460_v47  ;;  %vm755_vm15 = vcmp.eq.f32.partialorder %v401_v50, 8.507059e+37  ;;  %v404_v58 = vor.u32 1.1754944e-38, %v403_v51  ;;  %v438_v62 = vand.u32 2147483648, %v426_v46 }
  0x51   : > { %vm466_vm2 = vweird.f32 %v460_v47  ;;  %v472_v1 = vand.u32 2147483648, %v460_v47  ;;  %v470_v4 = vand.u32 2147483647, %v460_v47  ;;  %vm437_vm6 = vcmp.eq.f32.partialorder %v436_v61, 8.507059e+37 }
  0x52   : > { %v439_v7 = vor.u32 1.1754944e-38, %v438_v62 }
  0x53   : > { %v473_v10 = vor.u32 1.1754944e-38, %v472_v1  ;;  %vm471_vm8 = vcmp.eq.f32.partialorder %v470_v4, 8.507059e+37 }
  0x54   : > { %v656_v48 = vpop.eup %655 }
  0x55   : > { %v393_v49 = vmul.f32 %v656_v48, %v391_v43  ;;  %vm398_vm12 = vweird.f32 %v656_v48  ;;  %v658_v53 = vpop.eup %657 }
  0x56   : > { %v660_v55 = vpop.eup %659  ;;  %vm751_vm14 = vmor %vm397_vm11, %vm398_vm12  ;;  %v428_v59 = vmul.f32 %v658_v53, %v426_v46  ;;  %vm433_vm1 = vweird.f32 %v658_v53 }
  0x57   : > { %v394_v52 = vsub.f32 1.0, %v393_v49  ;;  %v462_v63 = vmul.f32 %v660_v55, %v460_v47  ;;  %vm467_vm3 = vweird.f32 %v660_v55  ;;  %vm434_vm5 = vmor %vm432_vm0, %vm433_vm1 }
  0x58   : > { %v429_v0 = vsub.f32 1.0, %v428_v59  ;;  %vm468_vm7 = vmor %vm466_vm2, %vm467_vm3 }
  0x59   : > { %v395_v54 = vmul.f32 %v656_v48, %v394_v52  ;;  %v463_v3 = vsub.f32 1.0, %v462_v63 }
  0x5a   : > { %v430_v6 = vmul.f32 %v658_v53, %v429_v0 }
  0x5b   : > { %v396_v60 = vadd.f32 %v656_v48, %v395_v54  ;;  %v464_v8 = vmul.f32 %v660_v55, %v463_v3 }
  0x5c   : > { %v431_v9 = vadd.f32 %v658_v53, %v430_v6 }
  0x5d   : > { %v400_v2 = vsel %vm751_vm14, %v656_v48, %v396_v60  ;;  %v465_v11 = vadd.f32 %v660_v55, %v464_v8 }
  0x5e   : > { %v405_v5 = vsel %vm755_vm15, %v404_v58, %v400_v2  ;;  %v435_v12 = vsel %vm434_vm5, %v658_v53, %v431_v9 }
  0x5f   : > { %408 = vst.msk [vmem:[%s285_s11 - $0x1] sm:$0x2] %vm407_vm13, %v405_v5  ;;  %v440_v13 = vsel %vm437_vm6, %v439_v7, %v435_v12  ;;  %v469_v14 = vsel %vm468_vm7, %v660_v55, %v465_v11 }
  0x60   : > { %442 = vst.msk [vmem:[%s285_s11 + $0x1] sm:$0x1] %vm357_vm4, %v440_v13  ;;  %v474_v15 = vsel %vm471_vm8, %v473_v10, %v469_v14 }
  0x61   : > { %477 = vst.msk [vmem:[%s285_s11 - $0x1] sm:$0x8] %vm476_vm9, %v474_v15 }
  0x62 PF: > { %s14_s17 = sadd.s32 1, %s683_s17   ;;  %s787_s15 = smov %s679_s16 }
  0x63   : > { %p11_p5 = scmp.ge.s32.totalorder %s14_s17, 4   ;;  %s788_s16 = smov %s790_s18 }
  0x65   :  { %13 = sbr.rel (!%p11_p5) target bundleno = 2 (0x2), region = 75 }

</bundles_post_ra>
